<compile_context>
chip_gen: v5e
topology: v5e:2x2
jax: 0.10.0
libtpu: 0.0.40
codegen_flags: <defaults>
</compile_context>

<pallas_src>
import functools
import math

import jax
import jax.numpy as jnp
from jax.experimental import pallas as pl
from jax.experimental.pallas import tpu as pltpu


_NEG_BIG = -1e30  # bias for padded class lanes -> exp() underflows to exactly 0


def _ensemble_kernel(x_ref, w_ref, b_ref, lw_ref, seg_ref, red_ref, o_ref):
    """One grid step = one batch tile; all learners handled in packed lanes.

    x_ref   : VMEM (bm, Dp)    f32   flattened input tile (cast to bf16 here)
    w_ref   : VMEM (Dp, LKp)   bf16  packed weights, lane j = l*K + k
    b_ref   : VMEM (1,  LKp)   f32   packed biases (-1e30 in padded lanes)
    lw_ref  : VMEM (1,  LKp)   f32   learner weight broadcast per lane
    seg_ref : VMEM (LKp, LKp)  f32   1 iff lanes i,j belong to the same learner
    red_ref : VMEM (LKp, Kp)   f32   1 at (l*K+k, k): sum over learners per class
    o_ref   : VMEM (bm, Kp)    f32   ensemble output tile (lane-dense store)
    """
    x = x_ref[...].astype(jnp.bfloat16)             # in-kernel cast (VPU)

    # Packed logits for every learner in one MXU matmul (f32 accumulate).
    z = jnp.dot(x, w_ref[...], preferred_element_type=jnp.float32) + b_ref[...]

    # Shared row max over all packed lanes (single XLU reduce per tile).
    m = jnp.max(z, axis=-1, keepdims=True)
    e = jnp.exp(z - m)                              # EUP; padded lanes -> 0

    # Per-learner softmax denominator, broadcast back to every lane of its
    # segment with one small MXU matmul (no XLU segment-sum, no gather).
    denom = jnp.dot(e, seg_ref[...], preferred_element_type=jnp.float32)
    denom = jnp.maximum(denom, 1e-30)               # padded lanes: avoid 0*inf

    # Ensemble weight folded into the (EUP) reciprocal -> one fewer vmul pass.
    scale = lw_ref[...] * pl.reciprocal(denom, approx=True)
    w_probs = e * scale                             # lw_l * softmax_l, packed

    # Sum over learners at fixed class, emitted lane-dense into Kp lanes (MXU).
    o_ref[...] = jnp.dot(w_probs, red_ref[...], preferred_element_type=jnp.float32)


def pack_learner_params(W, b, learner_weights):
    """One-time packing of all learners' parameters (do NOT repack per call).

    W: (L, D, K); b: (L, 1, K); learner_weights: (L,).
    Packed lane index is j = l*K + k, padded up to LKp = round_up(L*K, 128).
    """
    # TODO(synk): for very large L*K the (LKp, LKp) segment matrix grows
    # quadratically; fall back to a per-learner loop with sliced weight refs.
    L, D, K = W.shape
    LK = L * K
    LKp = pl.cdiv(LK, 128) * 128
    Kp = pl.cdiv(K, 128) * 128
    Dp = pl.cdiv(D, 128) * 128

    Wf = W.astype(jnp.float32)
    w_packed = jnp.zeros((Dp, LKp), jnp.float32)
    w_packed = w_packed.at[:D, :LK].set(jnp.transpose(Wf, (1, 0, 2)).reshape(D, LK))
    w_packed = w_packed.astype(jnp.bfloat16)

    b_packed = jnp.full((1, LKp), _NEG_BIG, jnp.float32)
    b_packed = b_packed.at[0, :LK].set(b.astype(jnp.float32).reshape(LK))

    lw_lane = jnp.zeros((1, LKp), jnp.float32)
    lw_lane = lw_lane.at[0, :LK].set(
        jnp.repeat(learner_weights.astype(jnp.float32), K))

    lane = jnp.arange(LKp)
    seg_id = jnp.where(lane < LK, lane // K, -1)          # learner of each lane
    seg_mat = ((seg_id[:, None] == seg_id[None, :])
               & (seg_id[:, None] >= 0)).astype(jnp.float32)

    cls_id = jnp.where(lane < LK, lane % K, -1)            # class of each lane
    out_lane = jnp.arange(Kp)
    red_mat = (cls_id[:, None] == out_lane[None, :]).astype(jnp.float32)

    return dict(w=w_packed, b=b_packed, lw=lw_lane, seg=seg_mat, red=red_mat)


def multi_learners_forward(x_nchw, w_packed, b_packed, lw_lane, seg_mat, red_mat,
                           *, n_classes, block_b=128):
    """x_nchw: (B, C, H, W) f32; packed params from pack_learner_params."""
    B = x_nchw.shape[0]
    D = math.prod(x_nchw.shape[1:])
    Dp, LKp = w_packed.shape
    Kp = red_mat.shape[1]

    # Batch tiling: sublane-aligned, and >=2 grid steps when possible so both
    # v7x TensorCores get work (v5e/v6e have a single TC — no cost there).
    B8 = pl.cdiv(B, 8) * 8
    bm = min(block_b, B8)
    if B8 >= 16:
        bm = min(bm, pl.cdiv(pl.cdiv(B8, 2), 8) * 8)
    Bp = pl.cdiv(B8, bm) * bm

    # Activation: pass the f32 reshape straight through when already aligned
    # (no host-side pad + bf16-cast round trip through HBM); the bf16 cast for
    # the MXU happens inside the kernel.
    x_flat = x_nchw.reshape(B, D).astype(jnp.float32)
    if (Bp, Dp) != (B, D):
        x_in = jnp.zeros((Bp, Dp), jnp.float32).at[:B, :D].set(x_flat)
    else:
        x_in = x_flat

    grid_spec = pltpu.PrefetchScalarGridSpec(
        num_scalar_prefetch=0,
        grid=(Bp // bm,),                                    # batch tiles only
        in_specs=[
            pl.BlockSpec((bm, Dp), lambda i: (i, 0)),        # x tile
            pl.BlockSpec((Dp, LKp), lambda i: (0, 0)),       # packed W (resident)
            pl.BlockSpec((1, LKp), lambda i: (0, 0)),        # packed bias
            pl.BlockSpec((1, LKp), lambda i: (0, 0)),        # learner-weight lanes
            pl.BlockSpec((LKp, LKp), lambda i: (0, 0)),      # segment matrix
            pl.BlockSpec((LKp, Kp), lambda i: (0, 0)),       # reduce matrix
        ],
        out_specs=pl.BlockSpec((bm, Kp), lambda i: (i, 0)),
    )

    out = pl.pallas_call(
        _ensemble_kernel,
        out_shape=jax.ShapeDtypeStruct((Bp, Kp), jnp.float32),
        grid_spec=grid_spec,
        compiler_params=pltpu.CompilerParams(
            dimension_semantics=("parallel",)),              # megacore / 2 TCs
    )(x_in, w_packed, b_packed, lw_lane, seg_mat, red_mat)

    return out[:B, :n_classes]


def reference_forward(x_nchw, W, b, learner_weights):
    B = x_nchw.shape[0]
    L, D, K = W.shape
    x_flat = x_nchw.reshape(B, D).astype(jnp.float32)
    logits = jnp.einsum('bd,ldk->lbk', x_flat, W.astype(jnp.float32)) \
        + b.astype(jnp.float32)                                    # (L, B, K)
    probs = jax.nn.softmax(logits, axis=-1)
    return jnp.sum(learner_weights.astype(jnp.float32)[:, None, None] * probs,
                   axis=0)


# TODO(synk): loss/eval_metric/reg_loss/bare_loss are host-side training
# utilities (data-loader loops over the forward pass); only forward() is
# kernelized.

if __name__ == "__main__":
    key = jax.random.PRNGKey(0)

    # Small synthetic shapes consistent with the module.
    B, C, H, Wsp = 8, 4, 16, 16
    D = C * H * Wsp            # 1024 flattened features
    K = 10                     # n_classes
    L = 3                      # n_learners

    k1, k2, k3, k4 = jax.random.split(key, 4)
    x = jax.random.normal(k1, (B, C, H, Wsp), dtype=jnp.float32)
    W = jax.random.normal(k2, (L, D, K), dtype=jnp.float32) * 0.05
    b = jax.random.normal(k3, (L, 1, K), dtype=jnp.float32) * 0.1
    # hyperparameter_module.get_weights() analog: deterministic positive weights
    learner_weights = jax.nn.softmax(jax.random.normal(k4, (L,), dtype=jnp.float32))

    # Parameters are packed once (weights are static across forward calls).
    params = pack_learner_params(W, b, learner_weights)

    fwd = jax.jit(functools.partial(multi_learners_forward, n_classes=K))
    out = fwd(x, params["w"], params["b"], params["lw"],
              params["seg"], params["red"])
    out = jax.block_until_ready(out)

    ref = reference_forward(x, W, b, learner_weights)
    assert out.shape == (B, K)
    # bf16 matmul operands + approx reciprocal -> loosened tolerance vs f32 ref.
    assert jnp.allclose(out, ref, atol=2e-2, rtol=2e-2), "mismatch vs reference"

    print("KERNEL_OK")
</pallas_src>

<mosaic_0001>
module attributes {stable_mosaic.version = 11 : i64} {
  func.func @_ensemble_kernel(%arg0: i32, %arg1: memref<8x1024xf32, #tpu.memory_space<vmem>>, %arg2: memref<1024x128xbf16, #tpu.memory_space<vmem>>, %arg3: memref<1x128xf32, #tpu.memory_space<vmem>>, %arg4: memref<1x128xf32, #tpu.memory_space<vmem>>, %arg5: memref<128x128xf32, #tpu.memory_space<vmem>>, %arg6: memref<128x128xf32, #tpu.memory_space<vmem>>, %arg7: memref<8x128xf32, #tpu.memory_space<vmem>>) attributes {dimension_semantics = [#tpu.dimension_semantics<parallel>], iteration_bounds = array<i64: 1>, scalar_prefetch = 0 : i64, scratch_operands = 0 : i64, tpu.core_type = #tpu.core_type<tc>, window_params = [{transform_indices = @transform_0, window_bounds = array<i64: 8, 1024>}, {pipeline_mode = #tpu.pipeline_mode<synchronous>, transform_indices = @transform_1, window_bounds = array<i64: 1024, 128>}, {pipeline_mode = #tpu.pipeline_mode<synchronous>, transform_indices = @transform_2, window_bounds = array<i64: 1, 128>}, {pipeline_mode = #tpu.pipeline_mode<synchronous>, transform_indices = @transform_3, window_bounds = array<i64: 1, 128>}, {pipeline_mode = #tpu.pipeline_mode<synchronous>, transform_indices = @transform_4, window_bounds = array<i64: 128, 128>}, {pipeline_mode = #tpu.pipeline_mode<synchronous>, transform_indices = @transform_5, window_bounds = array<i64: 128, 128>}, {transform_indices = @transform_6, window_bounds = array<i64: 8, 128>}]} {
    %c0 = arith.constant 0 : index
    %c0_0 = arith.constant 0 : index
    %0 = vector.load %arg1[%c0, %c0_0] : memref<8x1024xf32, #tpu.memory_space<vmem>>, vector<8x1024xf32>
    %1 = arith.truncf %0 : vector<8x1024xf32> to vector<8x1024xbf16>
    %c0_1 = arith.constant 0 : index
    %c0_2 = arith.constant 0 : index
    %2 = vector.load %arg2[%c0_1, %c0_2] : memref<1024x128xbf16, #tpu.memory_space<vmem>>, vector<1024x128xbf16>
    %cst = arith.constant dense<0.000000e+00> : vector<8x128xf32>
    %3 = tpu.matmul %1, %2, %cst {dimension_numbers = #tpu.dot_dimension_numbers<[1], [0], [0], [1], [0, 0, 1, 1], [], []>} : vector<8x1024xbf16>, vector<1024x128xbf16>, vector<8x128xf32> -> vector<8x128xf32>
    %c0_3 = arith.constant 0 : index
    %c0_4 = arith.constant 0 : index
    %4 = vector.load %arg3[%c0_3, %c0_4] : memref<1x128xf32, #tpu.memory_space<vmem>>, vector<1x128xf32>
    %5 = vector.broadcast %4 : vector<1x128xf32> to vector<8x128xf32>
    %6 = arith.addf %3, %5 : vector<8x128xf32>
    %cst_5 = arith.constant dense<0xFF800000> : vector<8xf32>
    %7 = vector.multi_reduction <maximumf>, %6, %cst_5 [1] : vector<8x128xf32> to vector<8xf32>
    %8 = vector.shape_cast %7 : vector<8xf32> to vector<8x1xf32>
    %9 = vector.broadcast %8 : vector<8x1xf32> to vector<8x128xf32>
    %10 = arith.subf %6, %9 : vector<8x128xf32>
    %11 = math.exp %10 : vector<8x128xf32>
    %c0_6 = arith.constant 0 : index
    %c0_7 = arith.constant 0 : index
    %12 = vector.load %arg5[%c0_6, %c0_7] : memref<128x128xf32, #tpu.memory_space<vmem>>, vector<128x128xf32>
    %cst_8 = arith.constant dense<0.000000e+00> : vector<8x128xf32>
    %13 = tpu.matmul %11, %12, %cst_8 {dimension_numbers = #tpu.dot_dimension_numbers<[1], [0], [0], [1], [0, 0, 1, 1], [], []>} : vector<8x128xf32>, vector<128x128xf32>, vector<8x128xf32> -> vector<8x128xf32>
    %cst_9 = arith.constant 1.000000e-30 : f32
    %14 = vector.broadcast %cst_9 : f32 to vector<8x128xf32>
    %15 = arith.maximumf %13, %14 : vector<8x128xf32>
    %c0_10 = arith.constant 0 : index
    %c0_11 = arith.constant 0 : index
    %16 = vector.load %arg4[%c0_10, %c0_11] : memref<1x128xf32, #tpu.memory_space<vmem>>, vector<1x128xf32>
    %17 = tpu.reciprocal %15 {approx = true} : vector<8x128xf32> -> vector<8x128xf32>
    %18 = vector.broadcast %16 : vector<1x128xf32> to vector<8x128xf32>
    %19 = arith.mulf %18, %17 : vector<8x128xf32>
    %20 = arith.mulf %11, %19 : vector<8x128xf32>
    %c0_12 = arith.constant 0 : index
    %c0_13 = arith.constant 0 : index
    %21 = vector.load %arg6[%c0_12, %c0_13] : memref<128x128xf32, #tpu.memory_space<vmem>>, vector<128x128xf32>
    %cst_14 = arith.constant dense<0.000000e+00> : vector<8x128xf32>
    %22 = tpu.matmul %20, %21, %cst_14 {dimension_numbers = #tpu.dot_dimension_numbers<[1], [0], [0], [1], [0, 0, 1, 1], [], []>} : vector<8x128xf32>, vector<128x128xf32>, vector<8x128xf32> -> vector<8x128xf32>
    %c0_15 = arith.constant 0 : index
    %c0_16 = arith.constant 0 : index
    %23 = vector.load %arg7[%c0_15, %c0_16] : memref<8x128xf32, #tpu.memory_space<vmem>>, vector<8x128xf32>
    tpu.vector_store %arg7[%c0_15, %c0_16], %22 {strides = array<i32>} : memref<8x128xf32, #tpu.memory_space<vmem>>, vector<8x128xf32>,
    return
  }
  func.func @transform_0(%arg0: i32) -> (i32, i32) {
    %c0_i32 = arith.constant 0 : i32
    %c0_i32_0 = arith.constant 0 : i32
    return %arg0, %c0_i32 : i32, i32
  }
  func.func @transform_1(%arg0: i32) -> (i32, i32) {
    %c0_i32 = arith.constant 0 : i32
    %c0_i32_0 = arith.constant 0 : i32
    %c0_i32_1 = arith.constant 0 : i32
    return %c0_i32, %c0_i32_0 : i32, i32
  }
  func.func @transform_2(%arg0: i32) -> (i32, i32) {
    %c0_i32 = arith.constant 0 : i32
    %c0_i32_0 = arith.constant 0 : i32
    %c0_i32_1 = arith.constant 0 : i32
    return %c0_i32, %c0_i32_0 : i32, i32
  }
  func.func @transform_3(%arg0: i32) -> (i32, i32) {
    %c0_i32 = arith.constant 0 : i32
    %c0_i32_0 = arith.constant 0 : i32
    %c0_i32_1 = arith.constant 0 : i32
    return %c0_i32, %c0_i32_0 : i32, i32
  }
  func.func @transform_4(%arg0: i32) -> (i32, i32) {
    %c0_i32 = arith.constant 0 : i32
    %c0_i32_0 = arith.constant 0 : i32
    %c0_i32_1 = arith.constant 0 : i32
    return %c0_i32, %c0_i32_0 : i32, i32
  }
  func.func @transform_5(%arg0: i32) -> (i32, i32) {
    %c0_i32 = arith.constant 0 : i32
    %c0_i32_0 = arith.constant 0 : i32
    %c0_i32_1 = arith.constant 0 : i32
    return %c0_i32, %c0_i32_0 : i32, i32
  }
  func.func @transform_6(%arg0: i32) -> (i32, i32) {
    %c0_i32 = arith.constant 0 : i32
    %c0_i32_0 = arith.constant 0 : i32
    return %arg0, %c0_i32 : i32, i32
  }
}

</mosaic_0001>

<bundles_post_ra>
// kernel: multi_learners_forward.1
= control target key start
LH: loop header
LB: loop body
LE: loop exit
PB: predicated region body
PF: predicated region fallthrough
CT: control target
= control target key end

     0   :  { %11 = vsyncpa [#allocation3], 0  ;;  %s1476_s0 = inlined_call_operand.vmem [shape: f32[8,1024], index: 0, kind: input, shape index: {}]   ;;  %s1477_s1 = inlined_call_operand.vmem [shape: bf16[1024,128], index: 1, kind: input, shape index: {}]   ;;  %s1478_s2 = inlined_call_operand.vmem [shape: f32[1,128], index: 2, kind: input, shape index: {}]   ;;  %s1479_s3 = inlined_call_operand.vmem [shape: f32[1,128], index: 3, kind: input, shape index: {}]   ;;  %s1480_s4 = inlined_call_operand.hbm [shape: f32[128,128], index: 4, kind: input, shape index: {}]   ;;  %s1481_s5 = inlined_call_operand.hbm [shape: f32[128,128], index: 5, kind: input, shape index: {}]   ;;  %s1482_s6 = inlined_call_operand.hbm [shape: f32[8,128], index: 6, kind: output, shape index: {}]  }
   0x1   :  { %12 = vsyncpa [#allocation6], 0 }
   0x2   :  { %13 = vsyncpa [#allocation4], 0  ;;  %s26_s23 = sshll.u32 %s1480_s4, 4  ;;  %s1205_s24 = smov [#allocation2]   ;;  %s27_s23 = int_to_ptr.hbm [resolvable:$true] %s26_s23 }
   0x3   :  { %s28_s25 = sshll.u32 %s1205_s24, 4  ;;  %s39_s28 = sshll.u32 %s1481_s5, 4  ;;  %s29_s25 = int_to_ptr.vmem [resolvable:$true] %s28_s25  ;;  %s40_s28 = int_to_ptr.hbm [resolvable:$true] %s39_s28 }
   0x4   :  { %s1206_s29 = smov 128   ;;  %s1207_s30 = smov 8  }
   0x5   :  { %34 = dma.hbm_to_vmem [thread:$0]  %s27_s23, 2048, %s29_s25, [#allocation3], %s1206_s29, %s1206_s29, %s1207_s30  }
   0x6   :  { %s1208_s7 = smov [#allocation5]  }
   0x7   :  { %s41_s8 = sshll.u32 %s1208_s7, 4  ;;  %s42_s8 = int_to_ptr.vmem [resolvable:$true] %s41_s8 }
   0x8   :  { %47 = dma.hbm_to_vmem [thread:$0]  %s40_s28, 2048, %s42_s8, [#allocation6], %s1206_s29, %s1206_s29, %s1207_s30  }
   0x9   :  { %1199 = dma.done.wait [#allocation3], 2048  }
   0xa   :  { %1200 = vsyncadd [#allocation3], 4294965248 }
   0xb   :  { %1201 = dma.done.wait [#allocation6], 2048  }
   0xc   :  { %1202 = vsyncadd [#allocation6], 4294965248  ;;  %v1059_v0 = vld [vmem:[%s1477_s1 + $0x38] sm:$0xff]  ;;  %v1058_v4 = vld [vmem:[%s1477_s1 + $0x30] sm:$0xff]  ;;  %s1209_s22 = smov [#allocation7]   ;;  %s785_s26 = sshll.u32 %s1482_s6, 4  ;;  %s786_s26 = int_to_ptr.hbm [resolvable:$true] %s785_s26 }
   0xd   :  { %v1067_v1 = vld [vmem:[%s1477_s1 + $0x78] sm:$0xff]  ;;  %588 = vmatpush.bf16.msra.mxu0 %v1059_v0  ;;  %v1066_v5 = vld [vmem:[%s1477_s1 + $0x70] sm:$0xff]  ;;  %v1057_v8 = vld [vmem:[%s1477_s1 + $0x28] sm:$0xff]  ;;  %s783_s23 = sshll.u32 %s1209_s22, 4  ;;  %s784_s23 = int_to_ptr.vmem [resolvable:$true] %s783_s23 }
   0xe   :  { %v1075_v2 = vld [vmem:[%s1477_s1 + $0xb8] sm:$0xff]  ;;  %601 = vmatpush.bf16.msra.mxu1 %v1067_v1  ;;  %v1074_v6 = vld [vmem:[%s1477_s1 + $0xb0] sm:$0xff]  ;;  %v1065_v9 = vld [vmem:[%s1477_s1 + $0x68] sm:$0xff] }
   0xf   :  { %v1083_v3 = vld [vmem:[%s1477_s1 + $0xf8] sm:$0xff]  ;;  %614 = vmatpush.bf16.msra.mxu2 %v1075_v2  ;;  %v1082_v7 = vld [vmem:[%s1477_s1 + $0xf0] sm:$0xff]  ;;  %v1073_v10 = vld [vmem:[%s1477_s1 + $0xa8] sm:$0xff] }
  0x10   :  { %627 = vmatpush.bf16.msra.mxu3 %v1083_v3  ;;  %v1081_v11 = vld [vmem:[%s1477_s1 + $0xe8] sm:$0xff]  ;;  %v1056_v12 = vld [vmem:[%s1477_s1 + $0x20] sm:$0xff]  ;;  %v1055_v16 = vld [vmem:[%s1477_s1 + $0x18] sm:$0xff] }
  0x11   :  { %589 = vmatpush.bf16.msra.mxu0 %v1058_v4  ;;  %v1064_v13 = vld [vmem:[%s1477_s1 + $0x60] sm:$0xff]  ;;  %v1063_v17 = vld [vmem:[%s1477_s1 + $0x58] sm:$0xff]  ;;  %v1054_v20 = vld [vmem:[%s1477_s1 + $0x10] sm:$0xff] }
  0x12   :  { %602 = vmatpush.bf16.msra.mxu1 %v1066_v5  ;;  %v1072_v14 = vld [vmem:[%s1477_s1 + $0xa0] sm:$0xff]  ;;  %v1071_v18 = vld [vmem:[%s1477_s1 + $0x98] sm:$0xff]  ;;  %v1062_v21 = vld [vmem:[%s1477_s1 + $0x50] sm:$0xff] }
  0x13   :  { %615 = vmatpush.bf16.msra.mxu2 %v1074_v6  ;;  %v1080_v15 = vld [vmem:[%s1477_s1 + $0xe0] sm:$0xff]  ;;  %v1079_v19 = vld [vmem:[%s1477_s1 + $0xd8] sm:$0xff]  ;;  %v1070_v22 = vld [vmem:[%s1477_s1 + $0x90] sm:$0xff] }
  0x14   :  { %628 = vmatpush.bf16.msra.mxu3 %v1082_v7  ;;  %v1078_v23 = vld [vmem:[%s1477_s1 + $0xd0] sm:$0xff]  ;;  %v1053_v24 = vld [vmem:[%s1477_s1 + $0x8] sm:$0xff]  ;;  %v1052_v28 = vld [vmem:[%s1477_s1] sm:$0xff] }
  0x15   :  { %590 = vmatpush.bf16.msra.mxu0 %v1057_v8  ;;  %v1061_v25 = vld [vmem:[%s1477_s1 + $0x48] sm:$0xff]  ;;  %v1060_v29 = vld [vmem:[%s1477_s1 + $0x40] sm:$0xff]  ;;  %v1091_v32 = vld [vmem:[%s1477_s1 + $0x138] sm:$0xff] }
  0x16   :  { %603 = vmatpush.bf16.msra.mxu1 %v1065_v9  ;;  %v1069_v26 = vld [vmem:[%s1477_s1 + $0x88] sm:$0xff]  ;;  %v1068_v30 = vld [vmem:[%s1477_s1 + $0x80] sm:$0xff]  ;;  %v58_v33 = vld [vmem:[%s1476_s0 + $0x10] sm:$0xff] }
  0x17   :  { %616 = vmatpush.bf16.msra.mxu2 %v1073_v10  ;;  %v1077_v27 = vld [vmem:[%s1477_s1 + $0xc8] sm:$0xff]  ;;  %v1076_v31 = vld [vmem:[%s1477_s1 + $0xc0] sm:$0xff]  ;;  %v1099_v35 = vld [vmem:[%s1477_s1 + $0x178] sm:$0xff]  ;;  %v66_v40 = vpack.c.bf16 %v58_v33, %v58_v33 }
  0x18   :  { %629 = vmatpush.bf16.msra.mxu3 %v1081_v11  ;;  %v56_v34 = vld [vmem:[%s1476_s0] sm:$0xff]  ;;  %v59_v36 = vld [vmem:[%s1476_s0 + $0x18] sm:$0xff]  ;;  %v57_v37 = vld [vmem:[%s1476_s0 + $0x8] sm:$0xff] }
  0x19   :  { %591 = vmatpush.bf16.msra.mxu0 %v1056_v12  ;;  %v1107_v38 = vld [vmem:[%s1477_s1 + $0x1b8] sm:$0xff]  ;;  %v64_v41 = vpack.c.bf16 %v56_v34, %v56_v34  ;;  %v67_v42 = vpack.c.bf16 %v59_v36, %v59_v36  ;;  %v65_v43 = vpack.c.bf16 %v57_v37, %v57_v37  ;;  %v1090_v44 = vld [vmem:[%s1477_s1 + $0x130] sm:$0xff]  ;;  %v1089_v48 = vld [vmem:[%s1477_s1 + $0x128] sm:$0xff] }
  0x1a   :  { %604 = vmatpush.bf16.msra.mxu1 %v1064_v13  ;;  %v1115_v39 = vld [vmem:[%s1477_s1 + $0x1f8] sm:$0xff]  ;;  %v1098_v45 = vld [vmem:[%s1477_s1 + $0x170] sm:$0xff]  ;;  %v1097_v49 = vld [vmem:[%s1477_s1 + $0x168] sm:$0xff] }
  0x1b   :  { %617 = vmatpush.bf16.msra.mxu2 %v1072_v14  ;;  %v1106_v46 = vld [vmem:[%s1477_s1 + $0x1b0] sm:$0xff]  ;;  %v1105_v50 = vld [vmem:[%s1477_s1 + $0x1a8] sm:$0xff]  ;;  %v1088_v52 = vld [vmem:[%s1477_s1 + $0x120] sm:$0xff] }
  0x1c   :  { %630 = vmatpush.bf16.msra.mxu3 %v1080_v15  ;;  %v1114_v47 = vld [vmem:[%s1477_s1 + $0x1f0] sm:$0xff]  ;;  %v1113_v51 = vld [vmem:[%s1477_s1 + $0x1e8] sm:$0xff]  ;;  %v1096_v53 = vld [vmem:[%s1477_s1 + $0x160] sm:$0xff] }
  0x1d   :  { %592 = vmatpush.bf16.msra.mxu0 %v1055_v16  ;;  %v1104_v54 = vld [vmem:[%s1477_s1 + $0x1a0] sm:$0xff]  ;;  %v1087_v56 = vld [vmem:[%s1477_s1 + $0x118] sm:$0xff]  ;;  %v1086_v60 = vld [vmem:[%s1477_s1 + $0x110] sm:$0xff] }
  0x1e   :  { %605 = vmatpush.bf16.msra.mxu1 %v1063_v17  ;;  %v1112_v55 = vld [vmem:[%s1477_s1 + $0x1e0] sm:$0xff]  ;;  %v1095_v57 = vld [vmem:[%s1477_s1 + $0x158] sm:$0xff]  ;;  %v1094_v61 = vld [vmem:[%s1477_s1 + $0x150] sm:$0xff] }
  0x1f   :  { %618 = vmatpush.bf16.msra.mxu2 %v1071_v18  ;;  %v1103_v58 = vld [vmem:[%s1477_s1 + $0x198] sm:$0xff]  ;;  %v1102_v62 = vld [vmem:[%s1477_s1 + $0x190] sm:$0xff]  ;;  %v1085_v0 = vld [vmem:[%s1477_s1 + $0x108] sm:$0xff] }
  0x20   :  { %631 = vmatpush.bf16.msra.mxu3 %v1079_v19  ;;  %v1111_v59 = vld [vmem:[%s1477_s1 + $0x1d8] sm:$0xff]  ;;  %v1110_v63 = vld [vmem:[%s1477_s1 + $0x1d0] sm:$0xff]  ;;  %v1093_v1 = vld [vmem:[%s1477_s1 + $0x148] sm:$0xff] }
  0x21   :  { %593 = vmatpush.bf16.msra.mxu0 %v1054_v20  ;;  %v1101_v2 = vld [vmem:[%s1477_s1 + $0x188] sm:$0xff]  ;;  %v1084_v4 = vld [vmem:[%s1477_s1 + $0x100] sm:$0xff]  ;;  %v62_v10 = vld [vmem:[%s1476_s0 + $0x30] sm:$0xff] }
  0x22   :  { %606 = vmatpush.bf16.msra.mxu1 %v1062_v21  ;;  %v1109_v3 = vld [vmem:[%s1477_s1 + $0x1c8] sm:$0xff]  ;;  %v1092_v5 = vld [vmem:[%s1477_s1 + $0x140] sm:$0xff]  ;;  %v63_v11 = vld [vmem:[%s1476_s0 + $0x38] sm:$0xff]  ;;  %v70_v14 = vpack.c.bf16 %v62_v10, %v62_v10 }
  0x23   :  { %619 = vmatpush.bf16.msra.mxu2 %v1070_v22  ;;  %v1100_v6 = vld [vmem:[%s1477_s1 + $0x180] sm:$0xff]  ;;  %v61_v8 = vld [vmem:[%s1476_s0 + $0x28] sm:$0xff]  ;;  %v71_v15 = vpack.c.bf16 %v63_v11, %v63_v11  ;;  %v712_v22 = vld [vmem:[#allocation2 + $0x78] sm:$0xff] }
  0x24   :  { %632 = vmatpush.bf16.msra.mxu3 %v1078_v23  ;;  %v60_v7 = vld [vmem:[%s1476_s0 + $0x20] sm:$0xff]  ;;  %v69_v13 = vpack.c.bf16 %v61_v8, %v61_v8  ;;  %v711_v23 = vld [vmem:[#allocation2 + $0x70] sm:$0xff]  ;;  %v706_v33 = vld [vmem:[#allocation2 + $0x48] sm:$0xff] }
  0x25   :  { %594 = vmatpush.bf16.msra.mxu0 %v1053_v24  ;;  %v1108_v9 = vld [vmem:[%s1477_s1 + $0x1c0] sm:$0xff]  ;;  %v68_v12 = vpack.c.bf16 %v60_v7, %v60_v7  ;;  %v704_v36 = vld [vmem:[#allocation2 + $0x38] sm:$0xff]  ;;  %v703_v37 = vld [vmem:[#allocation2 + $0x30] sm:$0xff] }
  0x26   :  { %607 = vmatpush.bf16.msra.mxu1 %v1061_v25  ;;  %v1121_v24 = vld [vmem:[%s1478_s2] ss:$0 sm:$0xff]  ;;  %v746_v7 = vld [vmem:[#allocation5 + $0x28] sm:$0xff]  ;;  %v743_v10 = vld [vmem:[#allocation5 + $0x10] sm:$0xff] }
  0x27   :  { %620 = vmatpush.bf16.msra.mxu2 %v1069_v26  ;;  %v710_v26 = vld [vmem:[#allocation2 + $0x68] sm:$0xff]  ;;  %v705_v34 = vld [vmem:[#allocation2 + $0x40] sm:$0xff] }
  0x28   :  { %633 = vmatpush.bf16.msra.mxu3 %v1077_v27  ;;  %v745_v8 = vld [vmem:[#allocation5 + $0x20] sm:$0xff]  ;;  %v742_v11 = vld [vmem:[#allocation5 + $0x8] sm:$0xff] }
  0x29   :  { %595 = vmatpush.bf16.msra.mxu0 %v1052_v28  ;;  %v709_v28 = vld [vmem:[#allocation2 + $0x60] sm:$0xff] }
  0x2a   :  { %608 = vmatpush.bf16.msra.mxu1 %v1060_v29 }
  0x2b   :  { %621 = vmatpush.bf16.msra.mxu2 %v1068_v30  ;;  %v708_v30 = vld [vmem:[#allocation2 + $0x58] sm:$0xff] }
  0x2c   :  { %634 = vmatpush.bf16.msra.mxu3 %v1076_v31  ;;  %596 = vmatmul.bf16.vlgmr.msra.gmra.mxu0 %v64_v41  ;;  %v707_v31 = vld [vmem:[#allocation2 + $0x50] sm:$0xff] }
  0x2d   :  { %640 = vmatpush.bf16.msrb.mxu0 %v1091_v32  ;;  %609 = vmatmul.bf16.vlgmr.msra.gmra.mxu1 %v65_v43 }
  0x2e   :  { %653 = vmatpush.bf16.msrb.mxu1 %v1099_v35  ;;  %622 = vmatmul.bf16.vlgmr.msra.gmra.mxu2 %v66_v40 }
  0x2f   :  { %666 = vmatpush.bf16.msrb.mxu2 %v1107_v38  ;;  %635 = vmatmul.bf16.vlgmr.msra.gmra.mxu3 %v67_v42 }
  0x30   :  { %679 = vmatpush.bf16.msrb.mxu3 %v1115_v39 }
  0x31   :  { %641 = vmatpush.bf16.msrb.mxu0 %v1090_v44 }
  0x32   :  { %654 = vmatpush.bf16.msrb.mxu1 %v1098_v45 }
  0x33   :  { %667 = vmatpush.bf16.msrb.mxu2 %v1106_v46 }
  0x34   :  { %680 = vmatpush.bf16.msrb.mxu3 %v1114_v47 }
  0x35   :  { %642 = vmatpush.bf16.msrb.mxu0 %v1089_v48 }
  0x36   :  { %655 = vmatpush.bf16.msrb.mxu1 %v1097_v49 }
  0x37   :  { %668 = vmatpush.bf16.msrb.mxu2 %v1105_v50 }
  0x38   :  { %681 = vmatpush.bf16.msrb.mxu3 %v1113_v51  ;;  %v702_v51 = vld [vmem:[#allocation2 + $0x28] sm:$0xff] }
  0x39   :  { %643 = vmatpush.bf16.msrb.mxu0 %v1088_v52  ;;  %v701_v52 = vld [vmem:[#allocation2 + $0x20] sm:$0xff] }
  0x3a   :  { %656 = vmatpush.bf16.msrb.mxu1 %v1096_v53  ;;  %v700_v53 = vld [vmem:[#allocation2 + $0x18] sm:$0xff] }
  0x3b   :  { %669 = vmatpush.bf16.msrb.mxu2 %v1104_v54  ;;  %v699_v54 = vld [vmem:[#allocation2 + $0x10] sm:$0xff] }
  0x3c   :  { %682 = vmatpush.bf16.msrb.mxu3 %v1112_v55  ;;  %v698_v55 = vld [vmem:[#allocation2 + $0x8] sm:$0xff] }
  0x3d   :  { %644 = vmatpush.bf16.msrb.mxu0 %v1087_v56  ;;  %v697_v56 = vld [vmem:[#allocation2] sm:$0xff] }
  0x3e   :  { %657 = vmatpush.bf16.msrb.mxu1 %v1095_v57  ;;  %v756_v57 = vld [vmem:[#allocation5 + $0x78] sm:$0xff] }
  0x3f   :  { %670 = vmatpush.bf16.msrb.mxu2 %v1103_v58  ;;  %v755_v58 = vld [vmem:[#allocation5 + $0x70] sm:$0xff] }
  0x40   :  { %683 = vmatpush.bf16.msrb.mxu3 %v1111_v59  ;;  %v754_v59 = vld [vmem:[#allocation5 + $0x68] sm:$0xff] }
  0x41   :  { %645 = vmatpush.bf16.msrb.mxu0 %v1086_v60  ;;  %v753_v60 = vld [vmem:[#allocation5 + $0x60] sm:$0xff] }
  0x42   :  { %658 = vmatpush.bf16.msrb.mxu1 %v1094_v61  ;;  %v752_v61 = vld [vmem:[#allocation5 + $0x58] sm:$0xff] }
  0x43   :  { %671 = vmatpush.bf16.msrb.mxu2 %v1102_v62  ;;  %v751_v62 = vld [vmem:[#allocation5 + $0x50] sm:$0xff] }
  0x44   :  { %684 = vmatpush.bf16.msrb.mxu3 %v1110_v63  ;;  %v750_v63 = vld [vmem:[#allocation5 + $0x48] sm:$0xff] }
  0x45   :  { %646 = vmatpush.bf16.msrb.mxu0 %v1085_v0  ;;  %v749_v0 = vld [vmem:[#allocation5 + $0x40] sm:$0xff] }
  0x46   :  { %659 = vmatpush.bf16.msrb.mxu1 %v1093_v1  ;;  %v748_v1 = vld [vmem:[#allocation5 + $0x38] sm:$0xff] }
  0x47   :  { %672 = vmatpush.bf16.msrb.mxu2 %v1101_v2 }
  0x48   :  { %685 = vmatpush.bf16.msrb.mxu3 %v1109_v3 }
  0x49   :  { %647 = vmatpush.bf16.msrb.mxu0 %v1084_v4 }
  0x4a   :  { %660 = vmatpush.bf16.msrb.mxu1 %v1092_v5 }
  0x4b   :  { %673 = vmatpush.bf16.msrb.mxu2 %v1100_v6  ;;  %v747_v6 = vld [vmem:[#allocation5 + $0x30] sm:$0xff] }
  0x4c   :  { %686 = vmatpush.bf16.msrb.mxu3 %v1108_v9  ;;  %648 = vmatmul.bf16.vlgmr.msrb.gmra.mxu0 %v68_v12  ;;  %v744_v9 = vld [vmem:[#allocation5 + $0x18] sm:$0xff]  ;;  %v741_v12 = vld [vmem:[#allocation5] sm:$0xff] }
  0x4d   :  { %661 = vmatmul.bf16.vlgmr.msrb.gmra.mxu1 %v69_v13  ;;  %713 = vmatpush.msra.mxu0 %v712_v22 }
  0x4e   :  { %674 = vmatmul.bf16.vlgmr.msrb.gmra.mxu2 %v70_v14  ;;  %757 = vmatpush.msra.mxu1 %v756_v57 }
  0x4f   :  { %687 = vmatmul.bf16.vlgmr.msrb.gmra.mxu3 %v71_v15  ;;  %714 = vmatpush.msra.mxu0 %v711_v23  ;;  %v1122_v15 = vld [vmem:[%s1479_s3] ss:$0 sm:$0xff] }
  0x50   :  { %758 = vmatpush.msra.mxu1 %v755_v58 }
  0x51   :  { %715 = vmatpush.msra.mxu0 %v710_v26 }
  0x52   :  { %759 = vmatpush.msra.mxu1 %v754_v59 }
  0x53   :  { %716 = vmatpush.msra.mxu0 %v709_v28 }
  0x54   :  { %760 = vmatpush.msra.mxu1 %v753_v60 }
  0x55   :  { %717 = vmatpush.msra.mxu0 %v708_v30 }
  0x56   :  { %761 = vmatpush.msra.mxu1 %v752_v61 }
  0x57   :  { %718 = vmatpush.msra.mxu0 %v707_v31 }
  0x58   :  { %762 = vmatpush.msra.mxu1 %v751_v62 }
  0x59   :  { %719 = vmatpush.msra.mxu0 %v706_v33 }
  0x5a   :  { %763 = vmatpush.msra.mxu1 %v750_v63 }
  0x5b   :  { %720 = vmatpush.msra.mxu0 %v705_v34 }
  0x5c   :  { %764 = vmatpush.msra.mxu1 %v749_v0 }
  0x5d   :  { %721 = vmatpush.msra.mxu0 %v704_v36 }
  0x5e   :  { %765 = vmatpush.msra.mxu1 %v748_v1 }
  0x5f   :  { %722 = vmatpush.msra.mxu0 %v703_v37 }
  0x60   :  { %766 = vmatpush.msra.mxu1 %v747_v6 }
  0x61   :  { %723 = vmatpush.msra.mxu0 %v702_v51 }
  0x62   :  { %767 = vmatpush.msra.mxu1 %v746_v7 }
  0x63   :  { %724 = vmatpush.msra.mxu0 %v701_v52 }
  0x64   :  { %768 = vmatpush.msra.mxu1 %v745_v8 }
  0x65   :  { %725 = vmatpush.msra.mxu0 %v700_v53 }
  0x66   :  { %769 = vmatpush.msra.mxu1 %v744_v9 }
  0x67   :  { %726 = vmatpush.msra.mxu0 %v699_v54 }
  0x68   :  { %770 = vmatpush.msra.mxu1 %v743_v10 }
  0x69   :  { %727 = vmatpush.msra.mxu0 %v698_v55 }
  0x6a   :  { %771 = vmatpush.msra.mxu1 %v742_v11 }
  0x6b   :  { %728 = vmatpush.msra.mxu0 %v697_v56 }
  0x6c   :  { %772 = vmatpush.msra.mxu1 %v741_v12 }
  0xa9   :  { %v597_v16 = vpop.f32.mrf.mxu0 }
  0xaa   :  { %v610_v17 = vpop.f32.mrf.mxu1  ;;  %v598_v29 = vadd.f32 %v1121_v24, %v597_v16 }
  0xac   :  { %v611_v32 = vadd.f32 %v610_v17, %v598_v29 }
  0xb1   :  { %v623_v18 = vpop.f32.mrf.mxu2  ;;  %v599_v20 = vpop.f32.mrf.mxu0 }
  0xb2   :  { %v636_v19 = vpop.f32.mrf.mxu3  ;;  %v612_v21 = vpop.f32.mrf.mxu1  ;;  %v624_v35 = vadd.f32 %v623_v18, %v611_v32 }
  0xb4   :  { %v637_v38 = vadd.f32 %v636_v19, %v624_v35 }
  0xb9   :  { %v625_v25 = vpop.f32.mrf.mxu2 }
  0xba   :  { %v638_v27 = vpop.f32.mrf.mxu3 }
  0xc9   :  { %v649_v39 = vpop.f32.mrf.mxu0 }
  0xca   :  { %v662_v40 = vpop.f32.mrf.mxu1  ;;  %v650_v41 = vadd.f32 %v649_v39, %v637_v38 }
  0xcc   :  { %v663_v42 = vadd.f32 %v662_v40, %v650_v41 }
  0xd1   :  { %v675_v43 = vpop.f32.mrf.mxu2  ;;  %v651_v46 = vpop.f32.mrf.mxu0 }
  0xd2   :  { %v688_v44 = vpop.f32.mrf.mxu3  ;;  %v676_v45 = vadd.f32 %v675_v43, %v663_v42  ;;  %v664_v47 = vpop.f32.mrf.mxu1 }
  0xd4   :  { %v689_v48 = vadd.f32 %v688_v44, %v676_v45 }
  0xd6   :  { %692 = vmax.xlane.f32.xlu0 %v689_v48 }
  0xd9   :  { %v677_v49 = vpop.f32.mrf.mxu2 }
  0xda   :  { %v690_v50 = vpop.f32.mrf.mxu3 }
 0x149   :  { %v693_v2 = vpop.xlane.xlu0 %692 }
 0x14a   :  { %v694_v3 = vsub.f32 %v689_v48, %v693_v2 }
 0x14c   :  { %v695_v4 = vmul.f32 1.442695, %v694_v3 }
 0x14e   :  { %1123 = vpow2.f32 %v695_v4 }
 0x154   :  { %v1124_v5 = vpop.eup %1123 }
 0x155   :  { %729 = vmatmul.f32.vlgmr.msra.gmra.mxu0 %v1124_v5 }
 0x1d2   :  { %v730_v13 = vpop.f32.mrf.mxu0 }
 0x1d3   :  { %v733_v14 = vmax.f32 %v730_v13, 1e-30 }
 0x1d5   :  { %1125 = vrcp.f32 %v733_v14 }
 0x1db   :  { %v1126_v16 = vpop.eup %1125 }
 0x1dc   :  { %v739_v17 = vmul.f32 %v1126_v16, %v1122_v15 }
 0x1de   :  { %v740_v18 = vmul.f32 %v1124_v5, %v739_v17 }
 0x1e0   :  { %773 = vmatmul.f32.vlgmr.msra.gmra.mxu1 %v740_v18 }
 0x25d   :  { %v774_v19 = vpop.f32.mrf.mxu1 }
 0x25e   :  { %777 = vst [vmem:[#allocation7] sm:$0xff] %v774_v19 }
 0x25f   :  { %788 = dma.vmem_to_hbm [thread:$0]  %s784_s23, 128, %s786_s26, [#allocation4]  }
 0x260   :  { %1203 = dma.done.wait [#allocation4], 128  }
 0x261   :  { %1204 = vsyncadd [#allocation4], 4294967168 }
 0x262   :  { %793 = vsyncpa [#allocation3], 1 }
 0x263   :  { %794 = vsyncpa [#allocation6], 1 }
 0x264   :  { %795 = vsyncpa [#allocation4], 1 }

</bundles_post_ra>
